<compile_context>
chip_gen: v7x
topology: tpu7x:2x2x1
jax: 0.10.0
libtpu: 0.0.40
codegen_flags: <defaults>
</compile_context>

<pallas_src>
import jax
import jax.numpy as jnp
from jax import lax
from jax.experimental import pallas as pl
from jax.experimental.pallas import tpu as pltpu

_LANES = 128
_SUBLANES = 8


def _masked_sq(x_ref, t_ref):
    """Elementwise pos/neg contributions of the masked MSE for one tile."""
    x = x_ref[...]
    t = t_ref[...]
    if x.dtype != jnp.float32:
        x = x.astype(jnp.float32)
    if t.dtype != jnp.float32:
        t = t.astype(jnp.float32)
    pos_id = (t == 1.0).astype(jnp.float32)
    neg_id = (t == 0.0).astype(jnp.float32)
    # Masks are mutually exclusive: where pos_id==1 target is exactly 1, where
    # neg_id==1 target is exactly 0, so a single squared term suffices.
    d = x - pos_id
    sq = d * d
    return pos_id * sq, neg_id * sq


def _write_partial(out_ref, pos_sum, neg_sum):
    """Write one lane-dense (1, 8, 128) block: sublane 0 = pos, sublane 1 = neg."""
    sub = lax.broadcasted_iota(jnp.int32, out_ref.shape, len(out_ref.shape) - 2)
    out_ref[...] = jnp.where(sub == 0, pos_sum,
                             jnp.where(sub == 1, neg_sum, 0.0))


def _mse_single_kernel(x_ref, t_ref, out_ref):
    """Whole array in one block: no grid phases, no accumulator."""
    pos, neg = _masked_sq(x_ref, t_ref)
    _write_partial(out_ref, jnp.sum(pos), jnp.sum(neg))


def _mse_tiled_kernel(x_ref, t_ref, out_ref, acc_ref):
    """grid = (chunks [parallel], steps [arbitrary, reduction over column tiles])."""
    j = pl.program_id(1)

    @pl.when(j == 0)
    def _init():
        acc_ref[...] = jnp.zeros_like(acc_ref)

    pos, neg = _masked_sq(x_ref, t_ref)
    # Pure VPU elementwise accumulation each step; single XLU reduce at the end.
    acc_ref[0] += pos
    acc_ref[1] += neg

    @pl.when(j == pl.num_programs(1) - 1)
    def _finalize():
        _write_partial(out_ref, jnp.sum(acc_ref[0]), jnp.sum(acc_ref[1]))


def mse_loss_pallas(inputs, targets):
    """Returns (pos_loss, neg_loss) scalars matching the PyTorch module (mean)."""
    assert inputs.shape == targets.shape and inputs.ndim == 2
    B, N = inputs.shape
    inv_b = jnp.float32(1.0 / B)  # batch-mean from the *logical* shape

    small = (N % _LANES != 0) or (B * N <= 32 * 1024)

    if small:
        out = pl.pallas_call(
            _mse_single_kernel,
            out_shape=jax.ShapeDtypeStruct((1, _SUBLANES, _LANES), jnp.float32),
            grid_spec=pltpu.PrefetchScalarGridSpec(
                num_scalar_prefetch=0,
                grid=(1,),
                in_specs=[
                    pl.BlockSpec((B, N), lambda i: (0, 0)),
                    pl.BlockSpec((B, N), lambda i: (0, 0)),
                ],
                out_specs=pl.BlockSpec((1, _SUBLANES, _LANES),
                                       lambda i: (0, 0, 0)),
            ),
            compiler_params=pltpu.CompilerParams(
                dimension_semantics=("arbitrary",)),
        )(inputs, targets)
    else:
        # Largest lane-aligned column tile that divides N and keeps the
        # double-buffered inputs (2 arrays x 2 buffers) within ~8 MiB, safe for
        # the smallest default scoped VMEM (16 MiB on v5e) across generations.
        vmem_budget = 8 * 1024 * 1024
        tile_n = _LANES
        for cand in (4096, 2048, 1024, 512, 256, 128):
            if N % cand == 0 and (2 * 2 * B * cand * 4) <= vmem_budget:
                tile_n = cand
                break
        total_steps = N // tile_n

        # Leading parallel axis: lets both TensorCores (v7x megacore) pull HBM.
        num_chunks = 2 if (total_steps % 2 == 0 and total_steps >= 2) else 1
        steps = total_steps // num_chunks

        out = pl.pallas_call(
            _mse_tiled_kernel,
            out_shape=jax.ShapeDtypeStruct((num_chunks, _SUBLANES, _LANES),
                                           jnp.float32),
            grid_spec=pltpu.PrefetchScalarGridSpec(
                num_scalar_prefetch=0,
                grid=(num_chunks, steps),
                in_specs=[
                    pl.BlockSpec((B, tile_n), lambda c, j: (0, c * steps + j)),
                    pl.BlockSpec((B, tile_n), lambda c, j: (0, c * steps + j)),
                ],
                out_specs=pl.BlockSpec((1, _SUBLANES, _LANES),
                                       lambda c, j: (c, 0, 0)),
                scratch_shapes=[pltpu.VMEM((2, B, tile_n), jnp.float32)],
            ),
            compiler_params=pltpu.CompilerParams(
                dimension_semantics=("parallel", "arbitrary")),
        )(inputs, targets)

    pos = jnp.sum(out[:, 0, 0]) * inv_b
    neg = jnp.sum(out[:, 1, 0]) * inv_b
    return pos, neg


def _mse_loss_ref(inputs, targets):
    pos_id = (targets == 1.0).astype(jnp.float32)
    neg_id = (targets == 0.0).astype(jnp.float32)
    pos_loss = pos_id * (inputs - targets) ** 2
    neg_loss = neg_id * inputs ** 2
    return (jnp.mean(jnp.sum(pos_loss, axis=1)),
            jnp.mean(jnp.sum(neg_loss, axis=1)))


if __name__ == "__main__":
    key = jax.random.PRNGKey(0)
    k1, k2, k3, k4 = jax.random.split(key, 4)

    # 1) Small YOLOv1-like shape (B, S*S*num_anchors) -> single-block fast path.
    B1, N1 = 8, 98
    x1 = jax.nn.sigmoid(jax.random.normal(k1, (B1, N1), dtype=jnp.float32))
    t1 = (jax.random.uniform(k2, (B1, N1)) > 0.8).astype(jnp.float32)
    t1 = t1.at[:, ::13].set(0.5)  # values that neither mask selects

    pos1, neg1 = mse_loss_pallas(x1, t1)
    rp1, rn1 = _mse_loss_ref(x1, t1)

    # 2) Larger lane-aligned shape -> tiled multi-chunk path.
    B2, N2 = 8, 16384
    x2 = jax.nn.sigmoid(jax.random.normal(k3, (B2, N2), dtype=jnp.float32))
    t2 = (jax.random.uniform(k4, (B2, N2)) > 0.7).astype(jnp.float32)

    pos2, neg2 = mse_loss_pallas(x2, t2)
    rp2, rn2 = _mse_loss_ref(x2, t2)

    jax.block_until_ready((pos1, neg1, pos2, neg2))

    assert jnp.allclose(pos1, rp1, rtol=1e-5, atol=1e-5)
    assert jnp.allclose(neg1, rn1, rtol=1e-5, atol=1e-5)
    assert jnp.allclose(pos2, rp2, rtol=1e-4, atol=1e-4)
    assert jnp.allclose(neg2, rn2, rtol=1e-4, atol=1e-4)

    print("KERNEL_OK")
</pallas_src>

<mosaic_0001>
module attributes {stable_mosaic.version = 11 : i64} {
  func.func @_mse_single_kernel(%arg0: i32, %arg1: memref<8x98xf32, #tpu.memory_space<vmem>>, %arg2: memref<8x98xf32, #tpu.memory_space<vmem>>, %arg3: memref<1x8x128xf32, #tpu.memory_space<vmem>>) attributes {dimension_semantics = [#tpu.dimension_semantics<arbitrary>], iteration_bounds = array<i64: 1>, scalar_prefetch = 0 : i64, scratch_operands = 0 : i64, tpu.core_type = #tpu.core_type<tc>, window_params = [{pipeline_mode = #tpu.pipeline_mode<synchronous>, transform_indices = @transform_0, window_bounds = array<i64: 8, 98>}, {pipeline_mode = #tpu.pipeline_mode<synchronous>, transform_indices = @transform_1, window_bounds = array<i64: 8, 98>}, {pipeline_mode = #tpu.pipeline_mode<synchronous>, transform_indices = @transform_2, window_bounds = array<i64: 1, 8, 128>}]} {
    %c0 = arith.constant 0 : index
    %c0_0 = arith.constant 0 : index
    %0 = vector.load %arg1[%c0, %c0_0] : memref<8x98xf32, #tpu.memory_space<vmem>>, vector<8x98xf32>
    %c0_1 = arith.constant 0 : index
    %c0_2 = arith.constant 0 : index
    %1 = vector.load %arg2[%c0_1, %c0_2] : memref<8x98xf32, #tpu.memory_space<vmem>>, vector<8x98xf32>
    %cst = arith.constant 1.000000e+00 : f32
    %2 = vector.broadcast %cst : f32 to vector<8x98xf32>
    %3 = arith.cmpf oeq, %1, %2 : vector<8x98xf32>
    %4 = arith.extui %3 : vector<8x98xi1> to vector<8x98xi32>
    %5 = arith.sitofp %4 : vector<8x98xi32> to vector<8x98xf32>
    %cst_3 = arith.constant 0.000000e+00 : f32
    %6 = vector.broadcast %cst_3 : f32 to vector<8x98xf32>
    %7 = arith.cmpf oeq, %1, %6 : vector<8x98xf32>
    %8 = arith.extui %7 : vector<8x98xi1> to vector<8x98xi32>
    %9 = arith.sitofp %8 : vector<8x98xi32> to vector<8x98xf32>
    %10 = arith.subf %0, %5 : vector<8x98xf32>
    %11 = arith.mulf %10, %10 : vector<8x98xf32>
    %12 = arith.mulf %5, %11 : vector<8x98xf32>
    %13 = arith.mulf %9, %11 : vector<8x98xf32>
    %14 = vector.shape_cast %12 : vector<8x98xf32> to vector<1x8x98xf32>
    %cst_4 = arith.constant dense<0.000000e+00> : vector<1xf32>
    %15 = vector.multi_reduction <add>, %14, %cst_4 [1, 2] : vector<1x8x98xf32> to vector<1xf32>
    %16 = vector.shape_cast %15 : vector<1xf32> to vector<1x1x1xf32>
    %17 = vector.extract %16[0, 0, 0] : f32 from vector<1x1x1xf32>
    %18 = vector.shape_cast %13 : vector<8x98xf32> to vector<1x8x98xf32>
    %cst_5 = arith.constant dense<0.000000e+00> : vector<1xf32>
    %19 = vector.multi_reduction <add>, %18, %cst_5 [1, 2] : vector<1x8x98xf32> to vector<1xf32>
    %20 = vector.shape_cast %19 : vector<1xf32> to vector<1x1x1xf32>
    %21 = vector.extract %20[0, 0, 0] : f32 from vector<1x1x1xf32>
    %22 = tpu.iota {dimensions = array<i32: 1>} : vector<1x8x128xi32>
    %c0_i32 = arith.constant 0 : i32
    %23 = vector.broadcast %c0_i32 : i32 to vector<1x8x128xi32>
    %24 = arith.cmpi eq, %22, %23 : vector<1x8x128xi32>
    %c1_i32 = arith.constant 1 : i32
    %25 = vector.broadcast %c1_i32 : i32 to vector<1x8x128xi32>
    %26 = arith.cmpi eq, %22, %25 : vector<1x8x128xi32>
    %cst_6 = arith.constant 0.000000e+00 : f32
    %27 = vector.broadcast %21 : f32 to vector<1x8x128xf32>
    %28 = vector.broadcast %cst_6 : f32 to vector<1x8x128xf32>
    %29 = arith.select %26, %27, %28 : vector<1x8x128xi1>, vector<1x8x128xf32>
    %30 = vector.broadcast %17 : f32 to vector<1x8x128xf32>
    %31 = arith.select %24, %30, %29 : vector<1x8x128xi1>, vector<1x8x128xf32>
    %c0_7 = arith.constant 0 : index
    %c0_8 = arith.constant 0 : index
    %c0_9 = arith.constant 0 : index
    %32 = vector.load %arg3[%c0_7, %c0_8, %c0_9] : memref<1x8x128xf32, #tpu.memory_space<vmem>>, vector<1x8x128xf32>
    tpu.vector_store %arg3[%c0_7, %c0_8, %c0_9], %31 {strides = array<i32>} : memref<1x8x128xf32, #tpu.memory_space<vmem>>, vector<1x8x128xf32>,
    return
  }
  func.func @transform_0(%arg0: i32) -> (i32, i32) {
    %c0_i32 = arith.constant 0 : i32
    %c0_i32_0 = arith.constant 0 : i32
    %c0_i32_1 = arith.constant 0 : i32
    return %c0_i32, %c0_i32_0 : i32, i32
  }
  func.func @transform_1(%arg0: i32) -> (i32, i32) {
    %c0_i32 = arith.constant 0 : i32
    %c0_i32_0 = arith.constant 0 : i32
    %c0_i32_1 = arith.constant 0 : i32
    return %c0_i32, %c0_i32_0 : i32, i32
  }
  func.func @transform_2(%arg0: i32) -> (i32, i32, i32) {
    %c0_i32 = arith.constant 0 : i32
    %c0_i32_0 = arith.constant 0 : i32
    %c0_i32_1 = arith.constant 0 : i32
    %c0_i32_2 = arith.constant 0 : i32
    return %c0_i32, %c0_i32_0, %c0_i32_1 : i32, i32, i32
  }
}

</mosaic_0001>

<bundles_post_ra>
// kernel: tpu_custom_call.1
= control target key start
LH: loop header
LB: loop body
LE: loop exit
PB: predicated region body
PF: predicated region fallthrough
CT: control target
= control target key end

     0   :  { %7 = vsyncpa [#allocation3], 0  ;;  %s231_s0 = inlined_call_operand.hbm [shape: f32[8,98], index: 0, kind: input, shape index: {}]   ;;  %s232_s1 = inlined_call_operand.hbm [shape: f32[8,98], index: 1, kind: input, shape index: {}]   ;;  %s233_s2 = inlined_call_operand.hbm [shape: f32[1,8,128], index: 2, kind: output, shape index: {}]  }
   0x1   :  { %8 = vsyncpa [#allocation6], 0 }
   0x2   :  { %9 = vsyncpa [#allocation4], 0  ;;  %s176_s9 = smov [#allocation2]   ;;  %s177_s11 = smov [#allocation5]  }
   0x3   :  { %s16_s10 = sshll.u32 %s176_s9, 4  ;;  %s26_s12 = sshll.u32 %s177_s11, 4  ;;  %s17_s10 = int_to_ptr.vmem [resolvable:$true] %s16_s10  ;;  %s27_s12 = int_to_ptr.vmem [resolvable:$true] %s26_s12 }
   0x4   :  { %s104_s15 = scalar_lea.hbm %s231_s0, 128 }
   0x5   :  { %p105_p0 = scmp.ne.s32.totalorder %s231_s0, %s104_s15  ;;  %p108_p1 = scmp.lt.u32.totalorder %s104_s15, %s231_s0 }
   0x7   :  { %p110_p2 = pnand %p108_p1, %p105_p0 }
   0x9   :  { %113 = shalt.err (!%p110_p2)
}
   0xa   :  { %s114_s20 = scalar_lea.vmem %s17_s10, 128  ;;  %p119_p4 = scmp.lt.s32.totalorder %s17_s10, %s17_s10 }
   0xb   :  { %p115_p3 = scmp.ne.s32.totalorder %s17_s10, %s114_s20  ;;  %p120_p5 = scmp.lt.s32.totalorder %s114_s20, %s114_s20 }
   0xd   :  { %p121_p6 = por %p120_p5, %p119_p4 }
   0xf   :  { %p122_p7 = pnand %p121_p6, %p115_p3 }
  0x11   :  { %125 = shalt.err (!%p122_p7)
}
  0x12   :  { %19 = dma.hbm_to_vmem [thread:$0]  %s231_s0, 128, %s17_s10, [#allocation3]  }
  0x13   :  { %s126_s25 = scalar_lea.hbm %s232_s1, 128 }
  0x14   :  { %p127_p8 = scmp.ne.s32.totalorder %s232_s1, %s126_s25  ;;  %p130_p9 = scmp.lt.u32.totalorder %s126_s25, %s232_s1 }
  0x16   :  { %p132_p10 = pnand %p130_p9, %p127_p8 }
  0x18   :  { %135 = shalt.err (!%p132_p10)
}
  0x19   :  { %s136_s30 = scalar_lea.vmem %s27_s12, 128  ;;  %p141_p12 = scmp.lt.s32.totalorder %s27_s12, %s27_s12 }
  0x1a   :  { %p137_p11 = scmp.ne.s32.totalorder %s27_s12, %s136_s30  ;;  %p142_p13 = scmp.lt.s32.totalorder %s136_s30, %s136_s30 }
  0x1c   :  { %p143_p0 = por %p142_p13, %p141_p12 }
  0x1e   :  { %p144_p1 = pnand %p143_p0, %p137_p11 }
  0x20   :  { %147 = shalt.err (!%p144_p1)
}
  0x21   :  { %29 = dma.hbm_to_vmem [thread:$0]  %s232_s1, 128, %s27_s12, [#allocation6]  }
  0x22   :  { %170 = dma.done.wait [#allocation3], 128  }
  0x23   :  { %171 = vsyncadd [#allocation3], 4294967168 }
  0x24   :  { %172 = dma.done.wait [#allocation6], 128  }
  0x25   :  { %173 = vsyncadd [#allocation6], 4294967168  ;;  %v36_v0 = vld [vmem:[#allocation2] sm:$0xff]  ;;  %v37_v1 = vld [vmem:[#allocation5] sm:$0xff]  ;;  %v178_v2 = vmov 0.0   ;;  %vm48_vm2 = vcmask 801792   ;;  %v69_v25 = vlaneseq }
  0x26   :  { %vm38_vm0 = vcmp.eq.f32.partialorder %v37_v1, 1.0  ;;  %vm41_vm1 = vcmp.eq.f32.partialorder %v37_v1, 0.0  ;;  %s179_s4 = smov [#allocation7]  }
  0x27   :  { %v94_v3 = vsel %vm38_vm0, 1.0, %v178_v2  ;;  %v95_v5 = vsel %vm41_vm1, 1.0, %v178_v2  ;;  %v70_v26 = vshrl.u32 %v69_v25, 7  ;;  %s84_s5 = sshll.u32 %s179_s4, 4  ;;  %s85_s5 = int_to_ptr.vmem [resolvable:$true] %s84_s5 }
  0x28   :  { %v44_v4 = vsub.f32 %v36_v0, %v94_v3  ;;  %s148_s7 = scalar_lea.vmem %s85_s5, 128  ;;  %p153_p3 = scmp.lt.s32.totalorder %s85_s5, %s85_s5 }
  0x29   :  { %vm72_vm3 = vcmp.eq.s32.totalorder %v70_v26, 1  ;;  %vm71_vm4 = vcmp.eq.s32.totalorder %v70_v26, 0  ;;  %p149_p2 = scmp.ne.s32.totalorder %s85_s5, %s148_s7  ;;  %p154_p4 = scmp.lt.s32.totalorder %s148_s7, %s148_s7 }
  0x2a   :  { %v45_v6 = vmul.f32 %v44_v4, %v44_v4 }
  0x2b   :  { %p155_p5 = por %p154_p4, %p153_p3 }
  0x2c   :  { %v46_v7 = vmul.f32 %v94_v3, %v45_v6  ;;  %v47_v8 = vmul.f32 %v95_v5, %v45_v6 }
  0x2d   :  { %p156_p6 = pnand %p155_p5, %p149_p2 }
  0x2e   :  { %v49_v9 = vsel %vm48_vm2, %v46_v7, 0.0  ;;  %v59_v10 = vsel %vm48_vm2, %v47_v8, 0.0 }
  0x2f   :  { %50 = vadd.xlane.f32.xlu0 %v49_v9 }
  0x33   :  { %60 = vadd.xlane.f32.xlu0 %v59_v10 }
  0xbc   :  { %v51_v11 = vpop.xlane.xlu0 %50 }
  0xbd   :  { %v52_v12 = vrot.slane %v51_v11, 4 }
  0xbf   :  { %v53_v13 = vadd.f32 %v52_v12, %v51_v11 }
  0xc0   :  { %v61_v14 = vpop.xlane.xlu0 %60 }
  0xc1   :  { %v54_v15 = vrot.slane %v53_v13, 2  ;;  %v62_v16 = vrot.slane %v61_v14, 4 }
  0xc3   :  { %v63_v17 = vadd.f32 %v62_v16, %v61_v14  ;;  %v55_v18 = vadd.f32 %v54_v15, %v53_v13 }
  0xc5   :  { %v64_v19 = vrot.slane %v63_v17, 2  ;;  %v56_v20 = vrot.slane %v55_v18, 1 }
  0xc7   :  { %v65_v21 = vadd.f32 %v64_v19, %v63_v17  ;;  %v57_v22 = vadd.f32 %v56_v20, %v55_v18 }
  0xc9   :  { %96 = vpush %v57_v22  ;;  %v66_v23 = vrot.slane %v65_v21, 1 }
  0xcb   :  { %v67_v24 = vadd.f32 %v66_v23, %v65_v21 }
  0xcd   :  { %98 = vpush %v67_v24 }
  0xfa   :  { %s97_s1 = spop %96 }
  0xfb   :  { %v75_v28 = vstv %s97_s1 }
  0xfe   :  { %s99_s6 = spop %98 }
  0xff   :  { %v73_v27 = vstv %s99_s6 }
 0x100   :  { %v74_v29 = vsel %vm72_vm3, %v73_v27, 0.0 }
 0x101   :  { %v76_v30 = vsel %vm71_vm4, %v75_v28, %v74_v29 }
 0x102   :  { %77 = vst [vmem:[#allocation7] sm:$0xff] %v76_v30 }
 0x103   :  { %159 = shalt.err (!%p156_p6)
}
 0x104   :  { %s160_s10 = scalar_lea.hbm %s233_s2, 128 }
 0x105   :  { %p161_p7 = scmp.ne.s32.totalorder %s233_s2, %s160_s10  ;;  %p164_p8 = scmp.lt.u32.totalorder %s160_s10, %s233_s2 }
 0x107   :  { %p166_p9 = pnand %p164_p8, %p161_p7 }
 0x109   :  { %169 = shalt.err (!%p166_p9)
}
 0x10a   :  { %87 = dma.vmem_to_hbm [thread:$0]  %s85_s5, 128, %s233_s2, [#allocation4]  }
 0x10b   :  { %174 = dma.done.wait [#allocation4], 128  }
 0x10c   :  { %175 = vsyncadd [#allocation4], 4294967168 }
 0x10d   :  { %91 = vsyncpa [#allocation3], 1 }
 0x10e   :  { %92 = vsyncpa [#allocation6], 1 }
 0x10f   :  { %93 = vsyncpa [#allocation4], 1 }

</bundles_post_ra>
